<compile_context>
chip_gen: v7x
topology: tpu7x:2x2x1
jax: 0.10.0
libtpu: 0.0.40
codegen_flags: <defaults>
</compile_context>

<pallas_src>
import jax
import jax.numpy as jnp
from jax.experimental import pallas as pl
from jax.experimental.pallas import tpu as pltpu


def _fused_mlp_kernel(x_ref, w_ref, b_ref, o_ref):
    # Single MXU matmul: [B, D](bf16) @ [D, O_pad](bf16) -> f32 accumulate.
    acc = jnp.dot(x_ref[...], w_ref[...], preferred_element_type=jnp.float32)
    # Bias add + store in f32 (lane-dense, O_pad is a multiple of 128).
    o_ref[...] = (acc + b_ref[...]).astype(o_ref.dtype)


def fully_connect_forward(x, params):
    """x: [B, C, H, W] float32 (NCHW). params: dict of transposed weights + biases."""
    b = x.shape[0]
    x_flat = x.reshape(b, -1)  # nn.Flatten()

    w1t, b1 = params["w1t"], params["b1"]
    w2t, b2 = params["w2t"], params["b2"]
    w3t, b3 = params["w3t"], params["b3"]

    out_features = w3t.shape[1]

    # --- Algebraic fusion of the activation-free chain (done once in the wrapper,
    #     in f32; constant-folds under jit when params are static) -----------------
    w_fused = (w1t @ w2t) @ w3t                       # [D, O]  f32
    b_fused = (b1 @ w2t + b2) @ w3t + b3              # [O]     f32

    # --- Pad output lane dimension to a multiple of 128 for lane-dense stores -----
    o_pad = ((out_features + 127) // 128) * 128
    pad = o_pad - out_features
    w_fused = jnp.pad(w_fused, ((0, 0), (0, pad)))    # [D, O_pad]
    b_fused = jnp.pad(b_fused, ((0, pad),))           # [O_pad]

    # --- Feed the MXU bf16; keep bias / accumulate / store in f32 -----------------
    x_bf16 = x_flat.astype(jnp.bfloat16)
    w_bf16 = w_fused.astype(jnp.bfloat16)
    b_f32 = b_fused.reshape(1, o_pad).astype(jnp.float32)

    vmem = pl.BlockSpec(memory_space=pltpu.MemorySpace.VMEM)
    out_padded = pl.pallas_call(
        _fused_mlp_kernel,
        out_shape=jax.ShapeDtypeStruct((b, o_pad), jnp.float32),
        in_specs=[vmem, vmem, vmem],
        out_specs=vmem,
    )(x_bf16, w_bf16, b_f32)

    return out_padded[:, :out_features]


def init_params(key, input_shape, hidden_units_1, hidden_units_2, output_shape):
    """Deterministic synthetic parameters. Weights stored as [in, out] (PyTorch W.T)."""
    ks = jax.random.split(key, 6)
    scale = 0.02
    return {
        "w1t": scale * jax.random.normal(ks[0], (input_shape, hidden_units_1), jnp.float32),
        "b1":  scale * jax.random.normal(ks[1], (hidden_units_1,), jnp.float32),
        "w2t": scale * jax.random.normal(ks[2], (hidden_units_1, hidden_units_2), jnp.float32),
        "b2":  scale * jax.random.normal(ks[3], (hidden_units_2,), jnp.float32),
        "w3t": scale * jax.random.normal(ks[4], (hidden_units_2, output_shape), jnp.float32),
        "b3":  scale * jax.random.normal(ks[5], (output_shape,), jnp.float32),
    }


if __name__ == "__main__":
    key = jax.random.PRNGKey(0)
    k_x, k_p = jax.random.split(key)

    # Small shapes consistent with the module: batch=2, C=4, H=W=16 -> D=1024
    B, C, H, W = 2, 4, 16, 16
    input_shape = C * H * W      # in_features of first Linear
    hidden_units_1 = 64
    hidden_units_2 = 32
    output_shape = 10

    x = jax.random.normal(k_x, (B, C, H, W), jnp.float32)
    params = init_params(k_p, input_shape, hidden_units_1, hidden_units_2, output_shape)

    out = jax.jit(fully_connect_forward)(x, params)
    out = jax.block_until_ready(out)

    # Pure-JAX f32 reference (same math as the PyTorch module: three chained linears)
    xf = x.reshape(B, -1)
    ref = xf @ params["w1t"] + params["b1"]
    ref = ref @ params["w2t"] + params["b2"]
    ref = ref @ params["w3t"] + params["b3"]

    assert out.shape == (B, output_shape)
    # bf16 MXU inputs + fused-weight rounding order -> slightly looser tolerance than pure f32.
    assert jnp.allclose(out, ref, atol=2e-3, rtol=2e-2), (
        f"max abs err {jnp.max(jnp.abs(out - ref))}"
    )

    print("KERNEL_OK")
</pallas_src>

<mosaic_0001>
module attributes {stable_mosaic.version = 11 : i64} {
  func.func @_fused_mlp_kernel(%arg0: memref<2x1024xbf16, #tpu.memory_space<vmem>>, %arg1: memref<1024x128xbf16, #tpu.memory_space<vmem>>, %arg2: memref<1x128xf32, #tpu.memory_space<vmem>>, %arg3: memref<2x128xf32, #tpu.memory_space<vmem>>) attributes {dimension_semantics = [], scalar_prefetch = 0 : i64, scratch_operands = 0 : i64, tpu.core_type = #tpu.core_type<tc>} {
    %c0 = arith.constant 0 : index
    %c0_0 = arith.constant 0 : index
    %0 = vector.load %arg0[%c0, %c0_0] : memref<2x1024xbf16, #tpu.memory_space<vmem>>, vector<2x1024xbf16>
    %c0_1 = arith.constant 0 : index
    %c0_2 = arith.constant 0 : index
    %1 = vector.load %arg1[%c0_1, %c0_2] : memref<1024x128xbf16, #tpu.memory_space<vmem>>, vector<1024x128xbf16>
    %cst = arith.constant dense<0.000000e+00> : vector<2x128xf32>
    %2 = tpu.matmul %0, %1, %cst {dimension_numbers = #tpu.dot_dimension_numbers<[1], [0], [0], [1], [0, 0, 1, 1], [], []>} : vector<2x1024xbf16>, vector<1024x128xbf16>, vector<2x128xf32> -> vector<2x128xf32>
    %c0_3 = arith.constant 0 : index
    %c0_4 = arith.constant 0 : index
    %3 = vector.load %arg2[%c0_3, %c0_4] : memref<1x128xf32, #tpu.memory_space<vmem>>, vector<1x128xf32>
    %4 = vector.broadcast %3 : vector<1x128xf32> to vector<2x128xf32>
    %5 = arith.addf %2, %4 : vector<2x128xf32>
    %c0_5 = arith.constant 0 : index
    %c0_6 = arith.constant 0 : index
    %6 = vector.load %arg3[%c0_5, %c0_6] : memref<2x128xf32, #tpu.memory_space<vmem>>, vector<2x128xf32>
    tpu.vector_store %arg3[%c0_5, %c0_6], %5 {strides = array<i32>} : memref<2x128xf32, #tpu.memory_space<vmem>>, vector<2x128xf32>,
    return
  }
}

</mosaic_0001>

<bundles_post_ra>
// kernel: fully_connect_forward.1
= control target key start
LH: loop header
LB: loop body
LE: loop exit
PB: predicated region body
PF: predicated region fallthrough
CT: control target
= control target key end

     0   :  { %v157_v28 = vlaneseq  ;;  %v1013_v36 = vmov 1966171168   ;;  %s1258_s0 = inlined_call_operand.vmem [shape: bf16[2,1024], index: 0, kind: input, shape index: {}]   ;;  %s1259_s1 = inlined_call_operand.vmem [shape: bf16[1024,128], index: 1, kind: input, shape index: {}]   ;;  %s1260_s2 = inlined_call_operand.vmem [shape: f32[1,128], index: 2, kind: input, shape index: {}]   ;;  %s1261_s3 = inlined_call_operand.hbm [shape: f32[2,128], index: 3, kind: output, shape index: {}]  }
   0x1   :  { %v924_v0 = vld [vmem:[%s1259_s1 + $0x40] sm:$0xff]   ;;  %v928_v4 = vld [vmem:[%s1259_s1 + $0x48] sm:$0xff]   ;;  %v932_v8 = vld [vmem:[%s1259_s1 + $0x50] sm:$0xff]   ;;  %v155_v37 = vunpack.c.l.s4 %v1013_v36 }
   0x2   :  { %v925_v1 = vld [vmem:[%s1259_s1 + $0xc0] sm:$0xff]   ;;  %834 = vmatprep.subr.bf16.mxu0 %v924_v0  ;;  %v929_v5 = vld [vmem:[%s1259_s1 + $0xc8] sm:$0xff]   ;;  %v933_v9 = vld [vmem:[%s1259_s1 + $0xd0] sm:$0xff]   ;;  %v158_v33 = vshrl.u32 %v157_v28, 7 }
   0x3   :  { %v926_v2 = vld [vmem:[%s1259_s1] sm:$0xff]   ;;  %856 = vmatprep.subr.bf16.mxu1 %v925_v1  ;;  %v930_v6 = vld [vmem:[%s1259_s1 + $0x8] sm:$0xff]   ;;  %v934_v10 = vld [vmem:[%s1259_s1 + $0x10] sm:$0xff]   ;;  %v156_v40 = vunpack.c.0.s8 %v155_v37 }
   0x4   :  { %v927_v3 = vld [vmem:[%s1259_s1 + $0x80] sm:$0xff]   ;;  %835 = vmatpush3.bf16.msra.mxu0 %v926_v2  ;;  %v931_v7 = vld [vmem:[%s1259_s1 + $0x88] sm:$0xff]   ;;  %v935_v11 = vld [vmem:[%s1259_s1 + $0x90] sm:$0xff]  }
   0x5   :  { %857 = vmatpush3.bf16.msra.mxu1 %v927_v3  ;;  %836 = vmatprep.subr.bf16.mxu0 %v928_v4  ;;  %v936_v12 = vld [vmem:[%s1259_s1 + $0x58] sm:$0xff]   ;;  %v940_v16 = vld [vmem:[%s1259_s1 + $0x60] sm:$0xff]   ;;  %v944_v20 = vld [vmem:[%s1259_s1 + $0x68] sm:$0xff]   ;;  %v1140_v41 = vsub.s32 %v156_v40, %v158_v33 }
   0x6   :  { %858 = vmatprep.subr.bf16.mxu1 %v929_v5  ;;  %v937_v13 = vld [vmem:[%s1259_s1 + $0xd8] sm:$0xff]   ;;  %v941_v17 = vld [vmem:[%s1259_s1 + $0xe0] sm:$0xff]   ;;  %v945_v21 = vld [vmem:[%s1259_s1 + $0xe8] sm:$0xff]  }
   0x7   :  { %v938_v14 = vld [vmem:[%s1259_s1 + $0x18] sm:$0xff]   ;;  %v942_v18 = vld [vmem:[%s1259_s1 + $0x20] sm:$0xff]   ;;  %v946_v22 = vld [vmem:[%s1259_s1 + $0x28] sm:$0xff]  }
   0x8   :  { %837 = vmatpush3.bf16.msra.mxu0 %v930_v6  ;;  %v939_v15 = vld [vmem:[%s1259_s1 + $0x98] sm:$0xff]   ;;  %v943_v19 = vld [vmem:[%s1259_s1 + $0xa0] sm:$0xff]   ;;  %v947_v23 = vld [vmem:[%s1259_s1 + $0xa8] sm:$0xff]  }
   0x9   :  { %859 = vmatpush3.bf16.msra.mxu1 %v931_v7  ;;  %838 = vmatprep.subr.bf16.mxu0 %v932_v8  ;;  %v948_v24 = vld [vmem:[%s1259_s1 + $0x70] sm:$0xff]   ;;  %v952_v29 = vld [vmem:[%s1259_s1 + $0x78] sm:$0xff]   ;;  %v16_v34 = vld [vmem:[%s1258_s0] sm:$0xff] }
   0xa   :  { %860 = vmatprep.subr.bf16.mxu1 %v933_v9  ;;  %v949_v25 = vld [vmem:[%s1259_s1 + $0xf0] sm:$0xff]   ;;  %v953_v30 = vld [vmem:[%s1259_s1 + $0xf8] sm:$0xff]   ;;  %v957_v35 = vld [vmem:[%s1259_s1 + $0x140] sm:$0xff]   ;;  %v153_v39 = vcombine.high %v16_v34, %v16_v34  ;;  %v160_v42 = vrot.slane %v16_v34, %v1140_v41 }
   0xb   :  { %v950_v26 = vld [vmem:[%s1259_s1 + $0x30] sm:$0xff]   ;;  %v954_v31 = vld [vmem:[%s1259_s1 + $0x38] sm:$0xff]   ;;  %v958_v38 = vld [vmem:[%s1259_s1 + $0x1c0] sm:$0xff]  }
   0xc   :  { %839 = vmatpush3.bf16.msra.mxu0 %v934_v10  ;;  %v951_v27 = vld [vmem:[%s1259_s1 + $0xb0] sm:$0xff]   ;;  %v955_v32 = vld [vmem:[%s1259_s1 + $0xb8] sm:$0xff]   ;;  %v1144_v43 = vrot.slane %v153_v39, %v1140_v41  ;;  %v168_v44 = vcombine.high %v160_v42, %v160_v42  ;;  %v176_v45 = vrot.slane %v160_v42, %v1140_v41  ;;  %v959_v48 = vld [vmem:[%s1259_s1 + $0x100] sm:$0xff]  }
   0xd   :  { %861 = vmatpush3.bf16.msra.mxu1 %v935_v11  ;;  %840 = vmatprep.subr.bf16.mxu0 %v936_v12  ;;  %v961_v51 = vld [vmem:[%s1259_s1 + $0x148] sm:$0xff]   ;;  %v960_v53 = vld [vmem:[%s1259_s1 + $0x180] sm:$0xff]   ;;  %v965_v57 = vld [vmem:[%s1259_s1 + $0x150] sm:$0xff]  }
   0xe   :  { %862 = vmatprep.subr.bf16.mxu1 %v937_v13  ;;  %v169_v46 = vcombine.high %v1144_v43, %v1144_v43  ;;  %v190_v47 = vrot.slane %v168_v44, %v1140_v41  ;;  %v198_v50 = vcombine.high %v176_v45, %v176_v45  ;;  %v962_v54 = vld [vmem:[%s1259_s1 + $0x1c8] sm:$0xff]   ;;  %v966_v59 = vld [vmem:[%s1259_s1 + $0x1d0] sm:$0xff]   ;;  %v969_v61 = vld [vmem:[%s1259_s1 + $0x158] sm:$0xff]  }
   0xf   :  { %v963_v56 = vld [vmem:[%s1259_s1 + $0x108] sm:$0xff]   ;;  %v967_v60 = vld [vmem:[%s1259_s1 + $0x110] sm:$0xff]   ;;  %v970_v63 = vld [vmem:[%s1259_s1 + $0x1d8] sm:$0xff]  }
  0x10   :  { %841 = vmatpush3.bf16.msra.mxu0 %v938_v14  ;;  %v197_v49 = vrot.slane %v169_v46, %v1140_v41  ;;  %626 = vmatprep.mubr.bf16.mxu0 %v190_v47  ;;  %v200_v52 = vcombine.high %v190_v47, %v190_v47  ;;  %v964_v58 = vld [vmem:[%s1259_s1 + $0x188] sm:$0xff]   ;;  %v968_v62 = vld [vmem:[%s1259_s1 + $0x190] sm:$0xff]   ;;  %v971_v0 = vld [vmem:[%s1259_s1 + $0x118] sm:$0xff]  }
  0x11   :  { %863 = vmatpush3.bf16.msra.mxu1 %v939_v15  ;;  %842 = vmatprep.subr.bf16.mxu0 %v940_v16  ;;  %v973_v1 = vld [vmem:[%s1259_s1 + $0x160] sm:$0xff]   ;;  %v972_v2 = vld [vmem:[%s1259_s1 + $0x198] sm:$0xff]   ;;  %v977_v5 = vld [vmem:[%s1259_s1 + $0x168] sm:$0xff]  }
  0x12   :  { %864 = vmatprep.subr.bf16.mxu1 %v941_v17  ;;  %v201_v55 = vcombine.high %v197_v49, %v197_v49  ;;  %666 = vmatprep.mubr.bf16.mxu1 %v200_v52  ;;  %v974_v3 = vld [vmem:[%s1259_s1 + $0x1e0] sm:$0xff]   ;;  %v978_v7 = vld [vmem:[%s1259_s1 + $0x1e8] sm:$0xff]   ;;  %v981_v9 = vld [vmem:[%s1259_s1 + $0x170] sm:$0xff]  }
  0x13   :  { %v975_v4 = vld [vmem:[%s1259_s1 + $0x120] sm:$0xff]   ;;  %v979_v8 = vld [vmem:[%s1259_s1 + $0x128] sm:$0xff]  }
  0x14   :  { %843 = vmatpush3.bf16.msra.mxu0 %v942_v18  ;;  %v976_v6 = vld [vmem:[%s1259_s1 + $0x1a0] sm:$0xff]  }
  0x15   :  { %865 = vmatpush3.bf16.msra.mxu1 %v943_v19  ;;  %844 = vmatprep.subr.bf16.mxu0 %v944_v20 }
  0x16   :  { %866 = vmatprep.subr.bf16.mxu1 %v945_v21 }
  0x18   :  { %845 = vmatpush3.bf16.msra.mxu0 %v946_v22 }
  0x19   :  { %867 = vmatpush3.bf16.msra.mxu1 %v947_v23  ;;  %846 = vmatprep.subr.bf16.mxu0 %v948_v24 }
  0x1a   :  { %868 = vmatprep.subr.bf16.mxu1 %v949_v25 }
  0x1c   :  { %847 = vmatpush3.bf16.msra.mxu0 %v950_v26 }
  0x1d   :  { %869 = vmatpush3.bf16.msra.mxu1 %v951_v27  ;;  %848 = vmatprep.subr.bf16.mxu0 %v952_v29 }
  0x1e   :  { %870 = vmatprep.subr.bf16.mxu1 %v953_v30 }
  0x20   :  { %849 = vmatpush3.bf16.msra.mxu0 %v954_v31 }
  0x21   :  { %871 = vmatpush3.bf16.msra.mxu1 %v955_v32  ;;  %878 = vmatprep.subr.bf16.mxu0 %v957_v35 }
  0x22   :  { %900 = vmatprep.subr.bf16.mxu1 %v958_v38 }
  0x23   :  { %627 = vmatmul.mubr.bf16.vlgmr.msra.gmra.mrb[0].mxu0 %v176_v45 }
  0x24   :  { %879 = vmatpush3.bf16.msra.mxu0 %v959_v48  ;;  %667 = vmatmul.mubr.bf16.vlgmr.msra.gmra.mrb[0].mxu1 %v198_v50 }
  0x25   :  { %880 = vmatprep.subr.bf16.mxu0 %v961_v51  ;;  %901 = vmatpush3.bf16.msra.mxu1 %v960_v53 }
  0x26   :  { %706 = vmatprep.mubr.bf16.mxu0 %v197_v49  ;;  %902 = vmatprep.subr.bf16.mxu1 %v962_v54 }
  0x27   :  { %746 = vmatprep.mubr.bf16.mxu1 %v201_v55 }
  0x28   :  { %881 = vmatpush3.bf16.msra.mxu0 %v963_v56 }
  0x29   :  { %882 = vmatprep.subr.bf16.mxu0 %v965_v57  ;;  %903 = vmatpush3.bf16.msra.mxu1 %v964_v58 }
  0x2a   :  { %904 = vmatprep.subr.bf16.mxu1 %v966_v59 }
  0x2c   :  { %883 = vmatpush3.bf16.msra.mxu0 %v967_v60 }
  0x2d   :  { %884 = vmatprep.subr.bf16.mxu0 %v969_v61  ;;  %905 = vmatpush3.bf16.msra.mxu1 %v968_v62 }
  0x2e   :  { %906 = vmatprep.subr.bf16.mxu1 %v970_v63 }
  0x30   :  { %885 = vmatpush3.bf16.msra.mxu0 %v971_v0 }
  0x31   :  { %886 = vmatprep.subr.bf16.mxu0 %v973_v1  ;;  %907 = vmatpush3.bf16.msra.mxu1 %v972_v2 }
  0x32   :  { %908 = vmatprep.subr.bf16.mxu1 %v974_v3 }
  0x34   :  { %887 = vmatpush3.bf16.msra.mxu0 %v975_v4 }
  0x35   :  { %888 = vmatprep.subr.bf16.mxu0 %v977_v5 }
  0x36   :  { %8 = vsyncpa [#allocation3], 0  ;;  %909 = vmatpush3.bf16.msra.mxu1 %v976_v6  ;;  %v980_v10 = vld [vmem:[%s1259_s1 + $0x1a8] sm:$0xff]   ;;  %v982_v11 = vld [vmem:[%s1259_s1 + $0x1f0] sm:$0xff]   ;;  %v183_v17 = vrot.slane %v1144_v43, %v1140_v41 }
  0x37   :  { %910 = vmatprep.subr.bf16.mxu1 %v978_v7  ;;  %v983_v12 = vld [vmem:[%s1259_s1 + $0x130] sm:$0xff]   ;;  %v985_v13 = vld [vmem:[%s1259_s1 + $0x178] sm:$0xff]   ;;  %v769_v21 = vld [vmem:[%s1260_s2] ss:$0 sm:$0xff] }
  0x38   :  { %889 = vmatpush3.bf16.msra.mxu0 %v979_v8  ;;  %v984_v14 = vld [vmem:[%s1259_s1 + $0x1b0] sm:$0xff]   ;;  %v986_v15 = vld [vmem:[%s1259_s1 + $0x1f8] sm:$0xff]   ;;  %v199_v19 = vcombine.high %v183_v17, %v183_v17 }
  0x39   :  { %890 = vmatprep.subr.bf16.mxu0 %v981_v9  ;;  %v987_v16 = vld [vmem:[%s1259_s1 + $0x138] sm:$0xff]  }
  0x3a   :  { %911 = vmatpush3.bf16.msra.mxu1 %v980_v10  ;;  %v988_v18 = vld [vmem:[%s1259_s1 + $0x1b8] sm:$0xff]   ;;  %s1014_s1 = smov [#allocation2]  }
  0x3b   :  { %912 = vmatprep.subr.bf16.mxu1 %v982_v11  ;;  %s761_s2 = sshll.u32 %s1014_s1, 4  ;;  %s762_s2 = int_to_ptr.vmem [resolvable:$true] %s761_s2 }
  0x3c   :  { %891 = vmatpush3.bf16.msra.mxu0 %v983_v12  ;;  %s989_s6 = scalar_lea.vmem %s762_s2, 32  ;;  %p994_p1 = scmp.lt.s32.totalorder %s762_s2, %s762_s2 }
  0x3d   :  { %892 = vmatprep.subr.bf16.mxu0 %v985_v13  ;;  %p990_p0 = scmp.ne.s32.totalorder %s762_s2, %s989_s6  ;;  %p995_p2 = scmp.lt.s32.totalorder %s989_s6, %s989_s6 }
  0x3e   :  { %913 = vmatpush3.bf16.msra.mxu1 %v984_v14 }
  0x3f   :  { %914 = vmatprep.subr.bf16.mxu1 %v986_v15  ;;  %p996_p3 = por %p995_p2, %p994_p1 }
  0x40   :  { %893 = vmatpush3.bf16.msra.mxu0 %v987_v16 }
  0x41   :  { %p997_p4 = pnand %p996_p3, %p990_p0 }
  0x42   :  { %915 = vmatpush3.bf16.msra.mxu1 %v988_v18 }
  0x43   :  { %707 = vmatmul.mubr.bf16.vlgmr.msra.gmra.mrb[4].mxu0 %v183_v17 }
  0x45   :  { %747 = vmatmul.mubr.bf16.vlgmr.msra.gmra.mrb[4].mxu1 %v199_v19 }
  0xf6   :  { %v850_v20 = vpop.f32.mrb[0].mxu0 }
  0xf7   :  { %v851_v22 = vpop.f32.mrb[1].mxu0  ;;  %v872_v23 = vpop.f32.mrb[0].mxu1 }
  0xf8   :  { %v852_v24 = vadd.f32 %v851_v22, %v850_v20  ;;  %v853_v25 = vpop.f32.mrb[2].mxu0  ;;  %v873_v26 = vpop.f32.mrb[1].mxu1 }
  0xf9   :  { %v854_v27 = vpop.f32.mrb[3].mxu0  ;;  %v874_v29 = vadd.f32 %v873_v26, %v872_v23  ;;  %v875_v30 = vpop.f32.mrb[2].mxu1 }
  0xfa   :  { %v629_v28 = vadd.f32 %v852_v24, %v769_v21  ;;  %v876_v31 = vpop.f32.mrb[3].mxu1 }
  0xfc   :  { %v669_v32 = vadd.f32 %v874_v29, %v629_v28 }
 0x116   :  { %v894_v33 = vpop.f32.mrb[4].mxu0 }
 0x117   :  { %v895_v34 = vpop.f32.mrb[5].mxu0 }
 0x118   :  { %v916_v35 = vpop.f32.mrb[4].mxu1  ;;  %v896_v36 = vadd.f32 %v895_v34, %v894_v33  ;;  %v897_v37 = vpop.f32.mrb[6].mxu0 }
 0x119   :  { %v917_v38 = vpop.f32.mrb[5].mxu1  ;;  %v898_v39 = vpop.f32.mrb[7].mxu0 }
 0x11a   :  { %v709_v40 = vadd.f32 %v896_v36, %v669_v32  ;;  %v918_v41 = vadd.f32 %v917_v38, %v916_v35  ;;  %v919_v42 = vpop.f32.mrb[6].mxu1 }
 0x11b   :  { %v920_v43 = vpop.f32.mrb[7].mxu1 }
 0x11c   :  { %v749_v44 = vadd.f32 %v918_v41, %v709_v40 }
 0x11e   :  { %754 = vst [vmem:[#allocation2] sm:$0x3] %v749_v44 }
 0x11f   :  { %1000 = shalt.err (!%p997_p4)
}
 0x120   :  { %s1001_s9 = scalar_lea.hbm %s1261_s3, 32 }
 0x121   :  { %p1002_p5 = scmp.ne.s32.totalorder %s1261_s3, %s1001_s9  ;;  %p1005_p6 = scmp.lt.u32.totalorder %s1001_s9, %s1261_s3 }
 0x123   :  { %p1007_p7 = pnand %p1005_p6, %p1002_p5 }
 0x125   :  { %1010 = shalt.err (!%p1007_p7)
}
 0x126   :  { %764 = dma.vmem_to_hbm [thread:$0]  %s762_s2, 32, %s1261_s3, [#allocation3]  }
 0x127   :  { %1011 = dma.done.wait [#allocation3], 32  }
 0x128   :  { %1012 = vsyncadd [#allocation3], 4294967264 }
 0x129   :  { %768 = vsyncpa [#allocation3], 1 }

</bundles_post_ra>
